<compile_context>
chip_gen: v5e
topology: v5e:2x2
jax: 0.10.0
libtpu: 0.0.40
codegen_flags: <defaults>
</compile_context>

<pallas_src>
import jax
import jax.numpy as jnp
from jax.experimental import pallas as pl
from jax.experimental.pallas import tpu as pltpu

_NHL_PAD = 128        # n_hl (5)  padded to a full lane tile for the fc2 matmul
_NOUT_PAD = 128       # nout (4)  padded to a full lane tile for the fc_mu matmul
_LEAKY_SLOPE = 0.01   # F.leaky_relu default negative_slope


def _netcont_kernel(x_ref, w1_ref, w2_ref, wmu_ref, mu_ref):
    nout = mu_ref.shape[-1]

    # x: (TM, nin). Cast in-kernel (no separate wrapper-side XLA cast pass).
    x = x_ref[...].astype(jnp.bfloat16)

    # fc1 on the folded weight: equivalent to fc1(cat(x, -x)), no bias.
    h1 = jnp.dot(x, w1_ref[...], preferred_element_type=jnp.float32)   # (TM, n_hidden) f32
    # leaky_relu in f32 (v5e-safe), result held as bf16 for the next MXU op.
    z1 = jnp.where(h1 >= 0.0, h1, _LEAKY_SLOPE * h1).astype(jnp.bfloat16)

    # fc2 (no bias) + sigmoid.  Padded output lanes (>= n_hl) become
    # sigmoid(0) = 0.5 but are neutralized by the zero rows of wmu.
    h2 = jnp.dot(z1, w2_ref[...], preferred_element_type=jnp.float32)  # (TM, NHL_PAD) f32
    # sigmoid = 1 / (1 + exp(-h)): exp + approx reciprocal both on the EUP slot.
    z2 = pl.reciprocal(1.0 + jnp.exp(-h2), approx=True).astype(jnp.bfloat16)

    # fc_mu (no bias) + relu. Compute lane-dense on the padded weight, then
    # store only the first nout columns (out block's last dim == full dim).
    mu_full = jnp.maximum(
        jnp.dot(z2, wmu_ref[...], preferred_element_type=jnp.float32), 0.0)  # (TM, NOUT_PAD) f32
    mu_ref[...] = mu_full[:, :nout]


def _pick_tile(batch, block_m):
    """Batch tile: multiple of 8, capped at block_m, and sized so the grid has
    >= 2 steps whenever batch > 8 (so v7x's 2 TensorCores both get work)."""
    if batch <= 8:
        return batch
    half = -(-batch // 2)                 # ceil(batch / 2)
    tm = ((half + 7) // 8) * 8            # round up to multiple of 8
    return min(block_m, tm)


def netcont_forward(x, params, *, block_m=1024):
    """Returns (mu, scale_tril) mirroring MultivariateNormal(mu, diag_embed(stdmax))."""
    w1_t = params["w1_t"]        # (nin, n_hidden)        bf16, concat folded in
    w2_t = params["w2_t"]        # (n_hidden, NHL_PAD)    bf16, zero-padded columns
    wmu_t = params["wmu_t"]      # (NHL_PAD, NOUT_PAD)    bf16, zero-padded rows/cols
    scale_tril = params["scale_tril"]
    nout = params["nout"]

    B, nin = x.shape
    n_hidden = w1_t.shape[1]

    tm = _pick_tile(B, block_m)
    grid = (pl.cdiv(B, tm),)

    mu = pl.pallas_call(
        _netcont_kernel,
        out_shape=jax.ShapeDtypeStruct((B, nout), jnp.float32),   # narrow output, no padding
        grid_spec=pltpu.PrefetchScalarGridSpec(
            num_scalar_prefetch=0,
            grid=grid,
            in_specs=[
                pl.BlockSpec((tm, nin), lambda i: (i, 0)),            # x: blocked on batch
                pl.BlockSpec((nin, n_hidden), lambda i: (0, 0)),      # weights: VMEM-resident
                pl.BlockSpec((n_hidden, _NHL_PAD), lambda i: (0, 0)),
                pl.BlockSpec((_NHL_PAD, _NOUT_PAD), lambda i: (0, 0)),
            ],
            out_specs=pl.BlockSpec((tm, nout), lambda i: (i, 0)),     # (tm, 4) contiguous block
        ),
        compiler_params=pltpu.CompilerParams(
            dimension_semantics=("parallel",),      # shards batch over v7x's 2 TCs
            vmem_limit_bytes=32 * 1024 * 1024,      # explicit; tiles use only a few MiB
        ),
    )(x, w1_t, w2_t, wmu_t)

    # TODO(synk): the MultivariateNormal distribution object has no Pallas
    # equivalent; we return its parameters (mu, scale_tril).
    return mu, scale_tril


def init_params(key, nin, nout, n_hidden=128, n_hl=5):
    """Raw PyTorch-layout weights (shapes match the module; init approximated)."""
    k1, k2, k3 = jax.random.split(key, 3)
    # TODO(synk): torch.nn.init.sparse_ has no direct JAX equivalent; using a
    # dense normal init — affects only the example weights, not forward math.
    w1 = 0.5 * jax.random.normal(k1, (n_hidden, 2 * nin), dtype=jnp.float32)
    w2 = 0.25 * jax.random.normal(k2, (n_hl, n_hidden), dtype=jnp.float32)
    wmu = 0.5 / n_hl + 0.001 * jax.random.normal(k3, (nout, n_hl), dtype=jnp.float32)
    stdmax = jnp.full((1, nout), 0.1, dtype=jnp.float32)
    return w1, w2, wmu, stdmax


def prepare_params(w1, w2, wmu, stdmax):
    """One-time glue: fold the symmetric concat, pad tiny dims, cast, hoist consts."""
    n_hidden, two_nin = w1.shape
    nin = two_nin // 2
    n_hl = w2.shape[0]
    nout = wmu.shape[0]

    # Fold cat((x, -x)) into fc1:  x_symm @ W1^T == x @ (W1a - W1b)^T.
    # (f32 subtract first, then cast — keep this order.)
    w1_eff_t = (w1[:, :nin] - w1[:, nin:]).T                       # (nin, n_hidden)

    # Lane-pad tiny output dims to 128 with zeros (zero wmu rows neutralize
    # the sigmoid(0)=0.5 values in padded z2 lanes).
    w2_t = jnp.zeros((n_hidden, _NHL_PAD), jnp.float32).at[:, :n_hl].set(w2.T)
    wmu_t = jnp.zeros((_NHL_PAD, _NOUT_PAD), jnp.float32).at[:n_hl, :nout].set(wmu.T)

    # Constant scale_tril = diag_embed(stdmax), hoisted out of forward().
    scale_tril = jnp.eye(nout, dtype=jnp.float32)[None, :, :] * stdmax[:, None, :]

    return {
        "w1_t": w1_eff_t.astype(jnp.bfloat16),
        "w2_t": w2_t.astype(jnp.bfloat16),
        "wmu_t": wmu_t.astype(jnp.bfloat16),
        "scale_tril": scale_tril,
        "nout": int(nout),
    }


def _ref_bf16(x, params, nout):
    """Reference 1: same math as the kernel (bf16 MXU operands, f32 accumulate,
    exact sigmoid instead of the EUP approx reciprocal)."""
    xb = x.astype(jnp.bfloat16)
    h1 = jnp.dot(xb, params["w1_t"], preferred_element_type=jnp.float32)
    z1 = jnp.where(h1 >= 0.0, h1, _LEAKY_SLOPE * h1).astype(jnp.bfloat16)
    h2 = jnp.dot(z1, params["w2_t"], preferred_element_type=jnp.float32)
    z2 = (1.0 / (1.0 + jnp.exp(-h2))).astype(jnp.bfloat16)
    mu = jnp.maximum(jnp.dot(z2, params["wmu_t"], preferred_element_type=jnp.float32), 0.0)
    return mu[:, :nout]


if __name__ == "__main__":
    key = jax.random.PRNGKey(0)
    k_x, k_x2, k_p = jax.random.split(key, 3)

    nin, nout, n_hidden, n_hl = 16, 4, 128, 5
    w1, w2, wmu, stdmax = init_params(k_p, nin, nout, n_hidden, n_hl)
    params = prepare_params(w1, w2, wmu, stdmax)

    # Two batch sizes: tiny (single grid step) and one that exercises a
    # 2-step "parallel" grid (the v7x dual-TC path).
    for bkey, batch in ((k_x, 2), (k_x2, 64)):
        x = jax.random.normal(bkey, (batch, nin), dtype=jnp.float32)

        mu, scale_tril = netcont_forward(x, params)
        jax.block_until_ready((mu, scale_tril))
        assert mu.shape == (batch, nout), f"bad mu shape {mu.shape}"

        # Reference 1: kernel-precision reference (bf16 MXU operands).
        mu_ref1 = _ref_bf16(x, params, nout)
        assert jnp.allclose(mu, mu_ref1, atol=5e-3, rtol=5e-3), "mismatch vs bf16 reference"

        # Reference 2: full-f32 PyTorch-style forward (explicit concat, raw weights).
        x_symm = jnp.concatenate([x, -x], axis=1)
        h32 = x_symm @ w1.T
        z1_32 = jnp.where(h32 >= 0.0, h32, _LEAKY_SLOPE * h32)
        z2_32 = jax.nn.sigmoid(z1_32 @ w2.T)
        mu_f32 = jnp.maximum(z2_32 @ wmu.T, 0.0)
        assert jnp.allclose(mu, mu_f32, atol=3e-2, rtol=5e-2), "mismatch vs f32 reference"

    expected_tril = jnp.eye(nout, dtype=jnp.float32)[None] * stdmax[:, None, :]
    assert jnp.allclose(params["scale_tril"], expected_tril), "scale_tril mismatch"

    print("KERNEL_OK")
</pallas_src>

<mosaic_0001>
module attributes {stable_mosaic.version = 11 : i64} {
  func.func @_netcont_kernel(%arg0: i32, %arg1: memref<2x16xf32, #tpu.memory_space<vmem>>, %arg2: memref<16x128xbf16, #tpu.memory_space<vmem>>, %arg3: memref<128x128xbf16, #tpu.memory_space<vmem>>, %arg4: memref<128x128xbf16, #tpu.memory_space<vmem>>, %arg5: memref<2x4xf32, #tpu.memory_space<vmem>>) attributes {dimension_semantics = [#tpu.dimension_semantics<parallel>], iteration_bounds = array<i64: 1>, scalar_prefetch = 0 : i64, scratch_operands = 0 : i64, tpu.core_type = #tpu.core_type<tc>, window_params = [{transform_indices = @transform_0, window_bounds = array<i64: 2, 16>}, {pipeline_mode = #tpu.pipeline_mode<synchronous>, transform_indices = @transform_1, window_bounds = array<i64: 16, 128>}, {pipeline_mode = #tpu.pipeline_mode<synchronous>, transform_indices = @transform_2, window_bounds = array<i64: 128, 128>}, {pipeline_mode = #tpu.pipeline_mode<synchronous>, transform_indices = @transform_3, window_bounds = array<i64: 128, 128>}, {transform_indices = @transform_4, window_bounds = array<i64: 2, 4>}]} {
    %c0 = arith.constant 0 : index
    %c0_0 = arith.constant 0 : index
    %0 = vector.load %arg1[%c0, %c0_0] : memref<2x16xf32, #tpu.memory_space<vmem>>, vector<2x16xf32>
    %1 = arith.truncf %0 : vector<2x16xf32> to vector<2x16xbf16>
    %c0_1 = arith.constant 0 : index
    %c0_2 = arith.constant 0 : index
    %2 = vector.load %arg2[%c0_1, %c0_2] : memref<16x128xbf16, #tpu.memory_space<vmem>>, vector<16x128xbf16>
    %cst = arith.constant dense<0.000000e+00> : vector<2x128xf32>
    %3 = tpu.matmul %1, %2, %cst {dimension_numbers = #tpu.dot_dimension_numbers<[1], [0], [0], [1], [0, 0, 1, 1], [], []>} : vector<2x16xbf16>, vector<16x128xbf16>, vector<2x128xf32> -> vector<2x128xf32>
    %cst_3 = arith.constant 0.000000e+00 : f32
    %4 = vector.broadcast %cst_3 : f32 to vector<2x128xf32>
    %5 = arith.cmpf oge, %3, %4 : vector<2x128xf32>
    %cst_4 = arith.constant 0.00999999977 : f32
    %6 = vector.broadcast %cst_4 : f32 to vector<2x128xf32>
    %7 = arith.mulf %6, %3 : vector<2x128xf32>
    %8 = arith.select %5, %3, %7 : vector<2x128xi1>, vector<2x128xf32>
    %9 = arith.truncf %8 : vector<2x128xf32> to vector<2x128xbf16>
    %c0_5 = arith.constant 0 : index
    %c0_6 = arith.constant 0 : index
    %10 = vector.load %arg3[%c0_5, %c0_6] : memref<128x128xbf16, #tpu.memory_space<vmem>>, vector<128x128xbf16>
    %cst_7 = arith.constant dense<0.000000e+00> : vector<2x128xf32>
    %11 = tpu.matmul %9, %10, %cst_7 {dimension_numbers = #tpu.dot_dimension_numbers<[1], [0], [0], [1], [0, 0, 1, 1], [], []>} : vector<2x128xbf16>, vector<128x128xbf16>, vector<2x128xf32> -> vector<2x128xf32>
    %cst_8 = arith.constant 0.000000e+00 : f32
    %12 = vector.broadcast %cst_8 : f32 to vector<2x128xf32>
    %13 = arith.subf %12, %11 : vector<2x128xf32>
    %14 = math.exp %13 : vector<2x128xf32>
    %cst_9 = arith.constant 1.000000e+00 : f32
    %15 = vector.broadcast %cst_9 : f32 to vector<2x128xf32>
    %16 = arith.addf %15, %14 : vector<2x128xf32>
    %17 = tpu.reciprocal %16 {approx = true} : vector<2x128xf32> -> vector<2x128xf32>
    %18 = arith.truncf %17 : vector<2x128xf32> to vector<2x128xbf16>
    %c0_10 = arith.constant 0 : index
    %c0_11 = arith.constant 0 : index
    %19 = vector.load %arg4[%c0_10, %c0_11] : memref<128x128xbf16, #tpu.memory_space<vmem>>, vector<128x128xbf16>
    %cst_12 = arith.constant dense<0.000000e+00> : vector<2x128xf32>
    %20 = tpu.matmul %18, %19, %cst_12 {dimension_numbers = #tpu.dot_dimension_numbers<[1], [0], [0], [1], [0, 0, 1, 1], [], []>} : vector<2x128xbf16>, vector<128x128xbf16>, vector<2x128xf32> -> vector<2x128xf32>
    %cst_13 = arith.constant 0.000000e+00 : f32
    %21 = vector.broadcast %cst_13 : f32 to vector<2x128xf32>
    %22 = arith.maximumf %20, %21 : vector<2x128xf32>
    %23 = vector.extract_strided_slice %22 {offsets = [0, 0], sizes = [2, 4], strides = [1, 1]} : vector<2x128xf32> to vector<2x4xf32>
    %c0_14 = arith.constant 0 : index
    %c0_15 = arith.constant 0 : index
    %24 = vector.load %arg5[%c0_14, %c0_15] : memref<2x4xf32, #tpu.memory_space<vmem>>, vector<2x4xf32>
    tpu.vector_store %arg5[%c0_14, %c0_15], %23 {strides = array<i32>} : memref<2x4xf32, #tpu.memory_space<vmem>>, vector<2x4xf32>,
    return
  }
  func.func @transform_0(%arg0: i32) -> (i32, i32) {
    %c0_i32 = arith.constant 0 : i32
    %c0_i32_0 = arith.constant 0 : i32
    return %arg0, %c0_i32 : i32, i32
  }
  func.func @transform_1(%arg0: i32) -> (i32, i32) {
    %c0_i32 = arith.constant 0 : i32
    %c0_i32_0 = arith.constant 0 : i32
    %c0_i32_1 = arith.constant 0 : i32
    return %c0_i32, %c0_i32_0 : i32, i32
  }
  func.func @transform_2(%arg0: i32) -> (i32, i32) {
    %c0_i32 = arith.constant 0 : i32
    %c0_i32_0 = arith.constant 0 : i32
    %c0_i32_1 = arith.constant 0 : i32
    return %c0_i32, %c0_i32_0 : i32, i32
  }
  func.func @transform_3(%arg0: i32) -> (i32, i32) {
    %c0_i32 = arith.constant 0 : i32
    %c0_i32_0 = arith.constant 0 : i32
    %c0_i32_1 = arith.constant 0 : i32
    return %c0_i32, %c0_i32_0 : i32, i32
  }
  func.func @transform_4(%arg0: i32) -> (i32, i32) {
    %c0_i32 = arith.constant 0 : i32
    %c0_i32_0 = arith.constant 0 : i32
    return %arg0, %c0_i32 : i32, i32
  }
}

</mosaic_0001>

<bundles_post_ra>
// kernel: tpu_custom_call.1
= control target key start
LH: loop header
LB: loop body
LE: loop exit
PB: predicated region body
PF: predicated region fallthrough
CT: control target
= control target key end

     0   :  { %9 = vsyncpa [#allocation3], 0  ;;  %s565_s0 = inlined_call_operand.hbm [shape: f32[2,16], index: 0, kind: input, shape index: {}]   ;;  %s566_s1 = inlined_call_operand.hbm [shape: bf16[16,128], index: 1, kind: input, shape index: {}]   ;;  %s567_s2 = inlined_call_operand.hbm [shape: bf16[128,128], index: 2, kind: input, shape index: {}]   ;;  %s568_s3 = inlined_call_operand.hbm [shape: bf16[128,128], index: 3, kind: input, shape index: {}]   ;;  %s569_s4 = inlined_call_operand.hbm [shape: f32[2,4], index: 4, kind: output, shape index: {}]  }
   0x1   :  { %10 = vsyncpa [#allocation6], 0 }
   0x2   :  { %11 = vsyncpa [#allocation9], 0  ;;  %s28_s17 = sshll.u32 %s566_s1, 4  ;;  %s29_s17 = int_to_ptr.hbm [resolvable:$true] %s28_s17 }
   0x3   :  { %12 = vsyncpa [#allocation4], 0  ;;  %s518_s18 = smov [#allocation5]   ;;  %s18_s22 = sshll.u32 %s565_s0, 4  ;;  %s19_s22 = int_to_ptr.hbm [resolvable:$true] %s18_s22 }
   0x4   :  { %s30_s19 = sshll.u32 %s518_s18, 4  ;;  %s519_s23 = smov 64   ;;  %s31_s19 = int_to_ptr.vmem [resolvable:$true] %s30_s19 }
   0x5   :  { %s520_s24 = smov 4   ;;  %s521_s25 = smov [#allocation2]  }
   0x6   :  { %36 = dma.hbm_to_vmem [thread:$0]  %s29_s17, 128, %s31_s19, [#allocation6], %s519_s23, %s519_s23, %s520_s24  }
   0x7   :  { %s20_s26 = sshll.u32 %s521_s25, 4  ;;  %s41_s29 = sshll.u32 %s567_s2, 4  ;;  %s21_s26 = int_to_ptr.vmem [resolvable:$true] %s20_s26  ;;  %s42_s29 = int_to_ptr.hbm [resolvable:$true] %s41_s29 }
   0x8   :  { %23 = dma.hbm_to_vmem [thread:$0]  %s19_s22, 32, %s21_s26, [#allocation3]  }
   0x9   :  { %s54_s5 = sshll.u32 %s568_s3, 4  ;;  %s522_s6 = smov [#allocation7]   ;;  %s55_s5 = int_to_ptr.hbm [resolvable:$true] %s54_s5 }
   0xa   :  { %s43_s7 = sshll.u32 %s522_s6, 4  ;;  %s523_s0 = smov [#allocation8]   ;;  %s44_s7 = int_to_ptr.vmem [resolvable:$true] %s43_s7 }
   0xb   :  { %49 = dma.hbm_to_vmem [thread:$0]  %s42_s29, 1024, %s44_s7, [#allocation6], %s519_s23, %s519_s23, %s520_s24  }
   0xc   :  { %s56_s8 = sshll.u32 %s523_s0, 4  ;;  %s57_s8 = int_to_ptr.vmem [resolvable:$true] %s56_s8 }
   0xd   :  { %62 = dma.hbm_to_vmem [thread:$0]  %s55_s5, 1024, %s57_s8, [#allocation9], %s519_s23, %s519_s23, %s520_s24  }
   0xe   :  { %510 = dma.done.wait [#allocation3], 32  }
   0xf   :  { %511 = vsyncadd [#allocation3], 4294967264 }
  0x10   :  { %512 = dma.done.wait [#allocation6], 1152  }
  0x11   :  { %513 = vsyncadd [#allocation6], 4294966144 }
  0x12   :  { %514 = dma.done.wait [#allocation9], 1024  }
  0x13   :  { %515 = vsyncadd [#allocation9], 4294966272  ;;  %v362_v0 = vld [vmem:[#allocation5] sm:$0xff]  ;;  %v80_v1 = vld [vmem:[#allocation2] sm:$0x3]  ;;  %vm90_vm0 = vcmask 130048  }
  0x14   :  { %v370_v2 = vld [vmem:[#allocation7 + $0x38] sm:$0xff]  ;;  %v81_v3 = vpack.c.bf16 %v80_v1, %v80_v1  ;;  %101 = vmatpush.bf16.msra.mxu0 %v362_v0  ;;  %v369_v4 = vld [vmem:[#allocation7 + $0x30] sm:$0xff]  ;;  %v368_v5 = vld [vmem:[#allocation7 + $0x28] sm:$0xff]  ;;  %s524_s2 = smov [#allocation10]   ;;  %s281_s11 = sshll.u32 %s569_s4, 4  ;;  %vm272_vm2 = vcmask 25600   ;;  %s282_s11 = int_to_ptr.hbm [resolvable:$true] %s281_s11 }
  0x15   :  { %175 = vmatpush.bf16.msra.mxu1 %v370_v2  ;;  %v367_v6 = vld [vmem:[#allocation7 + $0x20] sm:$0xff]  ;;  %v366_v7 = vld [vmem:[#allocation7 + $0x18] sm:$0xff]  ;;  %v365_v8 = vld [vmem:[#allocation7 + $0x10] sm:$0xff]  ;;  %s279_s3 = sshll.u32 %s524_s2, 4  ;;  %s280_s3 = int_to_ptr.vmem [resolvable:$true] %s279_s3 }
  0x16   :  { %v364_v9 = vld [vmem:[#allocation7 + $0x8] sm:$0xff]  ;;  %v363_v10 = vld [vmem:[#allocation7] sm:$0xff]  ;;  %v378_v11 = vld [vmem:[#allocation8 + $0x38] sm:$0xff] }
  0x17   :  { %297 = vmatmul.msk.bf16.vlgmr.msra.gmra.mxu0 %vm90_vm0, %v81_v3  ;;  %258 = vmatpush.bf16.msra.mxu2 %v378_v11  ;;  %v377_v12 = vld [vmem:[#allocation8 + $0x30] sm:$0xff]  ;;  %v376_v18 = vld [vmem:[#allocation8 + $0x28] sm:$0xff]  ;;  %v375_v19 = vld [vmem:[#allocation8 + $0x20] sm:$0xff] }
  0x18   :  { %v374_v20 = vld [vmem:[#allocation8 + $0x18] sm:$0xff]  ;;  %v373_v21 = vld [vmem:[#allocation8 + $0x10] sm:$0xff]  ;;  %v372_v22 = vld [vmem:[#allocation8 + $0x8] sm:$0xff] }
  0x19   :  { %176 = vmatpush.bf16.msra.mxu1 %v369_v4  ;;  %v371_v23 = vld [vmem:[#allocation8] sm:$0xff] }
  0x1b   :  { %259 = vmatpush.bf16.msra.mxu2 %v377_v12 }
  0x1d   :  { %177 = vmatpush.bf16.msra.mxu1 %v368_v5 }
  0x1f   :  { %260 = vmatpush.bf16.msra.mxu2 %v376_v18 }
  0x21   :  { %178 = vmatpush.bf16.msra.mxu1 %v367_v6 }
  0x23   :  { %261 = vmatpush.bf16.msra.mxu2 %v375_v19 }
  0x25   :  { %179 = vmatpush.bf16.msra.mxu1 %v366_v7 }
  0x27   :  { %262 = vmatpush.bf16.msra.mxu2 %v374_v20 }
  0x29   :  { %180 = vmatpush.bf16.msra.mxu1 %v365_v8 }
  0x2b   :  { %263 = vmatpush.bf16.msra.mxu2 %v373_v21 }
  0x2d   :  { %181 = vmatpush.bf16.msra.mxu1 %v364_v9 }
  0x2f   :  { %264 = vmatpush.bf16.msra.mxu2 %v372_v22 }
  0x31   :  { %182 = vmatpush.bf16.msra.mxu1 %v363_v10 }
  0x33   :  { %265 = vmatpush.bf16.msra.mxu2 %v371_v23 }
  0x94   :  { %v103_v13 = vpop.f32.mrf.mxu0 }
  0x95   :  { %vm107_vm1 = vcmp.ge.f32.partialorder %v103_v13, 0.0  ;;  %v108_v14 = vmul.f32 0.01, %v103_v13 }
  0x97   :  { %v109_v15 = vsel %vm107_vm1, %v103_v13, %v108_v14 }
  0x98   :  { %v110_v16 = vpack.c.bf16 %v109_v15, %v109_v15 }
  0x9a   :  { %183 = vmatmul.bf16.vlgmr.msra.gmra.mxu1 %v110_v16 }
  0x9c   :  { %v105_v17 = vpop.f32.mrf.mxu0 }
 0x117   :  { %v184_v24 = vpop.f32.mrf.mxu1 }
 0x118   :  { %v188_v25 = vsub.f32 0.0, %v184_v24 }
 0x11a   :  { %v189_v26 = vmul.f32 1.442695, %v188_v25 }
 0x11c   :  { %386 = vpow2.f32 %v189_v26 }
 0x11f   :  { %v186_v27 = vpop.f32.mrf.mxu1 }
 0x122   :  { %v387_v28 = vpop.eup %386 }
 0x123   :  { %v191_v29 = vadd.f32 1.0, %v387_v28 }
 0x125   :  { %388 = vrcp.f32 %v191_v29 }
 0x12b   :  { %v389_v30 = vpop.eup %388 }
 0x12c   :  { %v193_v31 = vpack.c.bf16 %v389_v30, %v389_v30 }
 0x12e   :  { %266 = vmatmul.bf16.vlgmr.msra.gmra.mxu2 %v193_v31 }
 0x1b1   :  { %v267_v32 = vpop.f32.mrf.mxu2 }
 0x1b2   :  { %v271_v33 = vmax.f32 %v267_v32, 0.0 }
 0x1b4   :  { %273 = vst.msk [vmem:[#allocation10] sm:$0x3] %vm272_vm2, %v271_v33 }
 0x1b5   :  { %284 = dma.vmem_to_hbm [thread:$0]  %s280_s3, 32, %s282_s11, [#allocation4]  }
 0x1b9   :  { %v269_v34 = vpop.f32.mrf.mxu2 }
 0x1ba   :  { %516 = dma.done.wait [#allocation4], 32  }
 0x1bb   :  { %517 = vsyncadd [#allocation4], 4294967264 }
 0x1bc   :  { %289 = vsyncpa [#allocation3], 1 }
 0x1bd   :  { %290 = vsyncpa [#allocation6], 1 }
 0x1be   :  { %291 = vsyncpa [#allocation9], 1 }
 0x1bf   :  { %292 = vsyncpa [#allocation4], 1 }

</bundles_post_ra>
